<compile_context>
chip_gen: v5e
topology: v5e:2x2
jax: 0.10.0
libtpu: 0.0.40
codegen_flags: <defaults>
</compile_context>

<pallas_src>
import numpy as np
import jax
import jax.numpy as jnp
from jax.experimental import pallas as pl
from jax.experimental.pallas import tpu as pltpu


# ---------------------------------------------------------------------------
# Kernels
# ---------------------------------------------------------------------------

def _fused_kernel(x_ref, w_ref, ld_ref):
    """Single-D-tile path: W fully resident, no reduction axis / scratch.

    x_ref : [TB, D]  stream dtype (bf16)
    w_ref : [D,  K]  stream dtype (same block for every grid step)
    ld_ref: [TB, 1]  float32 merged log-determinants
    """
    logdets = jnp.dot(x_ref[...], w_ref[...],
                      preferred_element_type=jnp.float32)          # [TB, K]
    n_components = logdets.shape[1]
    # Numerically-stable logsumexp over the component axis (dim=1).
    m = jnp.max(logdets, axis=1, keepdims=True)                    # [TB, 1]
    # Guard the degenerate all -inf row so we match jax.nn.logsumexp.
    m_safe = jnp.where(jnp.isfinite(m), m, jnp.zeros_like(m))
    s = jnp.sum(jnp.exp(logdets - m_safe), axis=1, keepdims=True)
    ld_ref[...] = m_safe + jnp.log(s) - float(np.log(n_components))


def _reduction_kernel(x_ref, w_ref, ld_ref, acc_ref):
    """Large-D path: accumulate per-component logdets over D tiles (MXU)."""
    k = pl.program_id(1)

    @pl.when(k == 0)
    def _():
        acc_ref[...] = jnp.zeros_like(acc_ref)

    acc_ref[...] += jnp.dot(x_ref[...], w_ref[...],
                            preferred_element_type=jnp.float32)

    @pl.when(k == pl.num_programs(1) - 1)
    def _():
        logdets = acc_ref[...]                                      # [TB, K]
        n_components = logdets.shape[1]
        m = jnp.max(logdets, axis=1, keepdims=True)
        m_safe = jnp.where(jnp.isfinite(m), m, jnp.zeros_like(m))
        s = jnp.sum(jnp.exp(logdets - m_safe), axis=1, keepdims=True)
        ld_ref[...] = m_safe + jnp.log(s) - float(np.log(n_components))


# ---------------------------------------------------------------------------
# Tiling / wrapper
# ---------------------------------------------------------------------------

_TB_CAP_DEFAULT = 512


def _vmem_plan():
    """(vmem_limit_bytes, tile_budget_bytes), sized from the chip's VMEM."""
    try:
        phys = int(pltpu.get_tpu_info().vmem_capacity_bytes)  # 64 MiB v7x, 128 MiB v5e/v6e
    except Exception:
        phys = 64 * 1024 * 1024                                # conservative (v7x)
    limit = min(int(phys * 0.78), 100 * 1024 * 1024)
    budget = max(limit - (6 << 20), 8 << 20)
    return limit, budget


def _pick_batch_tile(B, cap):
    """Largest multiple-of-8 divisor of B that still yields >= 2 batch tiles
    (so the 'parallel' axis can shard across v7x's two TensorCores); falls
    back to a single full-batch tile (no padding, no out-of-bounds blocks)."""
    if B < 16 or cap < 8:
        return B
    hi = min(cap, B // 2)
    hi -= hi % 8
    best = 0
    t = 8
    while t <= hi:
        if B % t == 0:
            best = t
        t += 8
    return best if best > 0 else B


def _pick_d_tile(D, cap):
    """Largest multiple-of-128 divisor of D that is <= cap (None if none)."""
    best = None
    t = 128
    while t <= cap:
        if D % t == 0:
            best = t
        t += 128
    return best


def _merged_logdets(x_flat, w, *, stream_dtype=jnp.bfloat16,
                    tb_cap=_TB_CAP_DEFAULT, td_cap=None):
    """logsumexp(x_flat @ w, axis=1) - log(K), fused in one Pallas kernel.

    x and W are streamed from HBM in `stream_dtype` (bf16 by default: the
    kernel is HBM-bandwidth bound, so halving bytes ~doubles throughput on
    v5e/v6e/v7x); the matmul accumulates in float32 on the MXU.
    """
    B, D = x_flat.shape
    K = w.shape[1]
    its = jnp.dtype(stream_dtype).itemsize

    x_s = x_flat.astype(stream_dtype)
    w_s = w.astype(stream_dtype)

    vmem_limit, budget = _vmem_plan()
    TB = _pick_batch_tile(B, tb_cap)
    nb = B // TB

    # Max D-tile that keeps (double-buffered x tile) + (double-buffered,
    # lane-padded K->128 W tile) + f32 accumulator/temps + slack in budget.
    per_td = 2 * TB * its + 2 * 128 * its
    fixed = TB * 128 * 4 * 4 + (2 << 20)
    td_fit = (budget - fixed) // per_td
    td_fit = max(128, (td_fit // 128) * 128)
    if td_cap is not None:
        td_fit = min(td_fit, max(128, (td_cap // 128) * 128))

    if D <= td_fit:
        # ---- Fast path: whole reduction in one tile, W fully resident. ----
        cost = pl.CostEstimate(
            flops=2 * B * D * K,
            transcendentals=B * (K + 1),
            bytes_accessed=B * D * its + D * K * its + B * 4,
        )
        ld = pl.pallas_call(
            _fused_kernel,
            out_shape=jax.ShapeDtypeStruct((B, 1), jnp.float32),
            grid_spec=pltpu.PrefetchScalarGridSpec(
                num_scalar_prefetch=0,
                grid=(nb,),
                in_specs=[
                    pl.BlockSpec((TB, D), lambda i: (i, 0)),
                    # Constant block index: W is DMA'd once and stays resident.
                    pl.BlockSpec((D, K), lambda i: (0, 0)),
                ],
                out_specs=pl.BlockSpec((TB, 1), lambda i: (i, 0)),
            ),
            compiler_params=pltpu.CompilerParams(
                dimension_semantics=("parallel",),
                vmem_limit_bytes=vmem_limit,
            ),
            cost_estimate=cost,
        )(x_s, w_s)
        return ld[:, 0]

    # ---- General path: tile D as a trailing "arbitrary" reduction axis. ----
    TD = _pick_d_tile(D, td_fit)
    if TD is None:
        # Rare: D has no multiple-of-128 divisor that fits -> zero-pad the
        # reduction axis (zero x columns x zero W rows contribute nothing).
        # TODO(synk): mask the D remainder in-kernel to avoid this pad copy.
        TD = td_fit
        Dp = ((D + TD - 1) // TD) * TD
        x_s = jnp.pad(x_s, ((0, 0), (0, Dp - D)))
        w_s = jnp.pad(w_s, ((0, Dp - D), (0, 0)))
    else:
        Dp = D
    nk = Dp // TD

    cost = pl.CostEstimate(
        flops=2 * B * Dp * K,
        transcendentals=B * (K + 1),
        bytes_accessed=B * Dp * its + nb * Dp * K * its + B * 4,
    )
    ld = pl.pallas_call(
        _reduction_kernel,
        out_shape=jax.ShapeDtypeStruct((B, 1), jnp.float32),
        grid_spec=pltpu.PrefetchScalarGridSpec(
            num_scalar_prefetch=0,
            grid=(nb, nk),
            in_specs=[
                pl.BlockSpec((TB, TD), lambda i, k: (i, k)),
                pl.BlockSpec((TD, K), lambda i, k: (k, 0)),
            ],
            out_specs=pl.BlockSpec((TB, 1), lambda i, k: (i, 0)),
            scratch_shapes=[pltpu.VMEM((TB, K), jnp.float32)],
        ),
        compiler_params=pltpu.CompilerParams(
            dimension_semantics=("parallel", "arbitrary"),
            vmem_limit_bytes=vmem_limit,
        ),
        cost_estimate=cost,
    )(x_s, w_s)
    return ld[:, 0]


def merge_logdets_forward(x_nchw, w, fixed):
    """Synthetic MergeLogDets.forward.

    x_nchw : [B, C, H, W] float32 (or bfloat16)
    w      : [C*H*W, K]   float32 (synthetic sub-module parameter)
    fixed  : dict with key 'y' (None -> merge components)
    Returns (y_nchw, logdets) where logdets is [B] if merged, else [B, K].
    """
    B, C, H, W_ = x_nchw.shape
    D = C * H * W_
    x_flat = x_nchw.reshape(B, D)

    if fixed.get('y', None) is not None:
        # Non-merged branch: per-component logdets returned unchanged.
        logdets = jnp.dot(x_flat, w, preferred_element_type=jnp.float32)
        return x_nchw, logdets

    # Merged branch. The sub-module output y == x, so we return the input
    # directly instead of round-tripping it through the kernel / HBM.
    logdets = _merged_logdets(x_flat, w)
    return x_nchw, logdets
    # TODO(synk): `invert` of the wrapped module has no forward-pass analogue.


if __name__ == "__main__":
    key = jax.random.PRNGKey(0)
    kx, kw, kx2 = jax.random.split(key, 3)

    # ---- Test 1: spec shapes (single-D-tile fast path, single batch tile) ----
    B, C, H, W = 2, 4, 16, 16
    K = 8  # n_components
    D = C * H * W

    x = jax.random.normal(kx, (B, C, H, W), dtype=jnp.float32)
    w = 0.01 * jax.random.normal(kw, (D, K), dtype=jnp.float32)

    y, logdets = merge_logdets_forward(x, w, {'y': None})
    y = jax.block_until_ready(y)
    logdets = jax.block_until_ready(logdets)

    assert y.shape == (B, C, H, W)
    assert logdets.shape == (B,)

    x_bf = x.reshape(B, D).astype(jnp.bfloat16)
    w_bf = w.astype(jnp.bfloat16)
    # Reference with the same bf16 streaming + f32 accumulation.
    ld_ref_bf16 = jax.nn.logsumexp(
        jnp.dot(x_bf, w_bf, preferred_element_type=jnp.float32), axis=1) - np.log(K)
    # Loose check against full-f32 semantics of the original module.
    ld_ref_f32 = jax.nn.logsumexp(
        jnp.dot(x.reshape(B, D), w, preferred_element_type=jnp.float32),
        axis=1) - np.log(K)

    np.testing.assert_allclose(np.asarray(logdets), np.asarray(ld_ref_bf16),
                               rtol=1e-4, atol=1e-4)
    np.testing.assert_allclose(np.asarray(logdets), np.asarray(ld_ref_f32),
                               rtol=5e-2, atol=5e-2)
    np.testing.assert_array_equal(np.asarray(y), np.asarray(x))

    # ---- Test 2: forced multi-tile path (reduction kernel + VMEM acc +
    #              >=2 batch tiles on the 'parallel' axis) ----
    B2 = 32
    x2 = jax.random.normal(kx2, (B2, C, H, W), dtype=jnp.float32)
    ld2 = _merged_logdets(x2.reshape(B2, D), w, tb_cap=16, td_cap=256)
    ld2 = jax.block_until_ready(ld2)

    ld2_ref = jax.nn.logsumexp(
        jnp.dot(x2.reshape(B2, D).astype(jnp.bfloat16), w_bf,
                preferred_element_type=jnp.float32), axis=1) - np.log(K)
    np.testing.assert_allclose(np.asarray(ld2), np.asarray(ld2_ref),
                               rtol=1e-4, atol=1e-4)

    print("KERNEL_OK")
</pallas_src>

<mosaic_0001>
module attributes {stable_mosaic.version = 11 : i64} {
  func.func @_fused_kernel(%arg0: i32, %arg1: memref<2x1024xbf16, #tpu.memory_space<vmem>>, %arg2: memref<1024x8xbf16, #tpu.memory_space<vmem>>, %arg3: memref<2x1xf32, #tpu.memory_space<vmem>>) attributes {dimension_semantics = [#tpu.dimension_semantics<parallel>], iteration_bounds = array<i64: 1>, scalar_prefetch = 0 : i64, scratch_operands = 0 : i64, tpu.core_type = #tpu.core_type<tc>, window_params = [{transform_indices = @transform_0, window_bounds = array<i64: 2, 1024>}, {pipeline_mode = #tpu.pipeline_mode<synchronous>, transform_indices = @transform_1, window_bounds = array<i64: 1024, 8>}, {transform_indices = @transform_2, window_bounds = array<i64: 2, 1>}]} {
    %c0 = arith.constant 0 : index
    %c0_0 = arith.constant 0 : index
    %0 = vector.load %arg1[%c0, %c0_0] : memref<2x1024xbf16, #tpu.memory_space<vmem>>, vector<2x1024xbf16>
    %c0_1 = arith.constant 0 : index
    %c0_2 = arith.constant 0 : index
    %1 = vector.load %arg2[%c0_1, %c0_2] : memref<1024x8xbf16, #tpu.memory_space<vmem>>, vector<1024x8xbf16>
    %cst = arith.constant dense<0.000000e+00> : vector<2x8xf32>
    %2 = tpu.matmul %0, %1, %cst {dimension_numbers = #tpu.dot_dimension_numbers<[1], [0], [0], [1], [0, 0, 1, 1], [], []>} : vector<2x1024xbf16>, vector<1024x8xbf16>, vector<2x8xf32> -> vector<2x8xf32>
    %cst_3 = arith.constant dense<0xFF800000> : vector<2xf32>
    %3 = vector.multi_reduction <maximumf>, %2, %cst_3 [1] : vector<2x8xf32> to vector<2xf32>
    %4 = vector.shape_cast %3 : vector<2xf32> to vector<2x1xf32>
    %5 = tpu.weird %4 : vector<2x1xf32> -> vector<2x1xi1>
    %cst_4 = arith.constant dense<true> : vector<2x1xi1>
    %6 = arith.xori %5, %cst_4 : vector<2x1xi1>
    %cst_5 = arith.constant 0.000000e+00 : f32
    %7 = vector.broadcast %cst_5 : f32 to vector<2x1xf32>
    %8 = arith.select %6, %4, %7 : vector<2x1xi1>, vector<2x1xf32>
    %9 = vector.broadcast %8 : vector<2x1xf32> to vector<2x8xf32>
    %10 = arith.subf %2, %9 : vector<2x8xf32>
    %11 = math.exp %10 : vector<2x8xf32>
    %cst_6 = arith.constant dense<0.000000e+00> : vector<2xf32>
    %12 = vector.multi_reduction <add>, %11, %cst_6 [1] : vector<2x8xf32> to vector<2xf32>
    %13 = vector.shape_cast %12 : vector<2xf32> to vector<2x1xf32>
    %14 = math.log %13 : vector<2x1xf32>
    %15 = arith.addf %8, %14 : vector<2x1xf32>
    %cst_7 = arith.constant 2.07944155 : f32
    %16 = vector.broadcast %cst_7 : f32 to vector<2x1xf32>
    %17 = arith.subf %15, %16 : vector<2x1xf32>
    %c0_8 = arith.constant 0 : index
    %c0_9 = arith.constant 0 : index
    %18 = vector.load %arg3[%c0_8, %c0_9] : memref<2x1xf32, #tpu.memory_space<vmem>>, vector<2x1xf32>
    tpu.vector_store %arg3[%c0_8, %c0_9], %17 {strides = array<i32>} : memref<2x1xf32, #tpu.memory_space<vmem>>, vector<2x1xf32>,
    return
  }
  func.func @transform_0(%arg0: i32) -> (i32, i32) {
    %c0_i32 = arith.constant 0 : i32
    %c0_i32_0 = arith.constant 0 : i32
    return %arg0, %c0_i32 : i32, i32
  }
  func.func @transform_1(%arg0: i32) -> (i32, i32) {
    %c0_i32 = arith.constant 0 : i32
    %c0_i32_0 = arith.constant 0 : i32
    %c0_i32_1 = arith.constant 0 : i32
    return %c0_i32, %c0_i32_0 : i32, i32
  }
  func.func @transform_2(%arg0: i32) -> (i32, i32) {
    %c0_i32 = arith.constant 0 : i32
    %c0_i32_0 = arith.constant 0 : i32
    return %arg0, %c0_i32 : i32, i32
  }
}

</mosaic_0001>

<bundles_post_ra>
// kernel: tpu_custom_call.1
= control target key start
LH: loop header
LB: loop body
LE: loop exit
PB: predicated region body
PF: predicated region fallthrough
CT: control target
= control target key end

     0   :  { %vm646_vm0 = vcmask 58368   ;;  %vm995_vm2 = vmmov 1   ;;  %vm663_vm4 = vcmask 1024   ;;  %s1209_s1 = inlined_call_operand.vmem [shape: bf16[1024,8], index: 1, kind: input, shape index: {}]   ;;  %s1210_s0 = inlined_call_operand.vmem [shape: bf16[2,1024], index: 0, kind: input, shape index: {}]   ;;  %s1211_s2 = inlined_call_operand.vmem [shape: f32[2,1], index: 2, kind: output, shape index: {}]  }
   0x1   :  { %v933_v0 = vld [vmem:[%s1209_s1 + $0x38] sm:$0xff]  ;;  %v932_v4 = vld [vmem:[%s1209_s1 + $0x30] sm:$0xff]  ;;  %v931_v8 = vld [vmem:[%s1209_s1 + $0x28] sm:$0xff] }
   0x2   :  { %v941_v1 = vld [vmem:[%s1209_s1 + $0x78] sm:$0xff]  ;;  %542 = vmatpush.bf16.msra.mxu0 %v933_v0  ;;  %v940_v5 = vld [vmem:[%s1209_s1 + $0x70] sm:$0xff]  ;;  %v939_v9 = vld [vmem:[%s1209_s1 + $0x68] sm:$0xff] }
   0x3   :  { %v949_v2 = vld [vmem:[%s1209_s1 + $0xb8] sm:$0xff]  ;;  %555 = vmatpush.bf16.msra.mxu1 %v941_v1  ;;  %v948_v6 = vld [vmem:[%s1209_s1 + $0xb0] sm:$0xff]  ;;  %v947_v10 = vld [vmem:[%s1209_s1 + $0xa8] sm:$0xff] }
   0x4   :  { %v957_v3 = vld [vmem:[%s1209_s1 + $0xf8] sm:$0xff]  ;;  %568 = vmatpush.bf16.msra.mxu2 %v949_v2  ;;  %v956_v7 = vld [vmem:[%s1209_s1 + $0xf0] sm:$0xff]  ;;  %v955_v11 = vld [vmem:[%s1209_s1 + $0xe8] sm:$0xff] }
   0x5   :  { %581 = vmatpush.bf16.msra.mxu3 %v957_v3  ;;  %v930_v12 = vld [vmem:[%s1209_s1 + $0x20] sm:$0xff]  ;;  %v929_v17 = vld [vmem:[%s1209_s1 + $0x18] sm:$0xff]  ;;  %v928_v21 = vld [vmem:[%s1209_s1 + $0x10] sm:$0xff] }
   0x6   :  { %543 = vmatpush.bf16.msra.mxu0 %v932_v4  ;;  %v938_v13 = vld [vmem:[%s1209_s1 + $0x60] sm:$0xff]  ;;  %v937_v18 = vld [vmem:[%s1209_s1 + $0x58] sm:$0xff]  ;;  %v936_v22 = vld [vmem:[%s1209_s1 + $0x50] sm:$0xff] }
   0x7   :  { %556 = vmatpush.bf16.msra.mxu1 %v940_v5  ;;  %v946_v14 = vld [vmem:[%s1209_s1 + $0xa0] sm:$0xff]  ;;  %v945_v19 = vld [vmem:[%s1209_s1 + $0x98] sm:$0xff]  ;;  %v944_v23 = vld [vmem:[%s1209_s1 + $0x90] sm:$0xff] }
   0x8   :  { %569 = vmatpush.bf16.msra.mxu2 %v948_v6  ;;  %v954_v15 = vld [vmem:[%s1209_s1 + $0xe0] sm:$0xff]  ;;  %v953_v20 = vld [vmem:[%s1209_s1 + $0xd8] sm:$0xff]  ;;  %v952_v24 = vld [vmem:[%s1209_s1 + $0xd0] sm:$0xff] }
   0x9   :  { %582 = vmatpush.bf16.msra.mxu3 %v956_v7  ;;  %v11_v16 = vld [vmem:[%s1210_s0] sm:$0xff]  ;;  %v927_v25 = vld [vmem:[%s1209_s1 + $0x8] sm:$0xff]  ;;  %v965_v33 = vld [vmem:[%s1209_s1 + $0x138] sm:$0xff] }
   0xa   :  { %544 = vmatpush.bf16.msra.mxu0 %v931_v8  ;;  %141 = vst [vmem:[#allocation1] ss:$9 sm:$0xff] %v11_v16  ;;  %v935_v26 = vld [vmem:[%s1209_s1 + $0x48] sm:$0xff]  ;;  %v926_v29 = vld [vmem:[%s1209_s1] sm:$0xff]  ;;  %v973_v34 = vld [vmem:[%s1209_s1 + $0x178] sm:$0xff] }
   0xb   :  { %557 = vmatpush.bf16.msra.mxu1 %v939_v9  ;;  %v943_v27 = vld [vmem:[%s1209_s1 + $0x88] sm:$0xff]  ;;  %v934_v30 = vld [vmem:[%s1209_s1 + $0x40] sm:$0xff]  ;;  %v981_v35 = vld [vmem:[%s1209_s1 + $0x1b8] sm:$0xff] }
   0xc   :  { %570 = vmatpush.bf16.msra.mxu2 %v947_v10  ;;  %v951_v28 = vld [vmem:[%s1209_s1 + $0xc8] sm:$0xff]  ;;  %v942_v31 = vld [vmem:[%s1209_s1 + $0x80] sm:$0xff]  ;;  %v989_v36 = vld [vmem:[%s1209_s1 + $0x1f8] sm:$0xff] }
   0xd   :  { %583 = vmatpush.bf16.msra.mxu3 %v955_v11  ;;  %v950_v32 = vld [vmem:[%s1209_s1 + $0xc0] sm:$0xff]  ;;  %v964_v37 = vld [vmem:[%s1209_s1 + $0x130] sm:$0xff]  ;;  %v963_v45 = vld [vmem:[%s1209_s1 + $0x128] sm:$0xff] }
   0xe   :  { %545 = vmatpush.bf16.msra.mxu0 %v930_v12  ;;  %v972_v40 = vld [vmem:[%s1209_s1 + $0x170] sm:$0xff]  ;;  %v971_v46 = vld [vmem:[%s1209_s1 + $0x168] sm:$0xff]  ;;  %v962_v49 = vld [vmem:[%s1209_s1 + $0x120] sm:$0xff] }
   0xf   :  { %558 = vmatpush.bf16.msra.mxu1 %v938_v13  ;;  %v980_v43 = vld [vmem:[%s1209_s1 + $0x1b0] sm:$0xff]  ;;  %v979_v47 = vld [vmem:[%s1209_s1 + $0x1a8] sm:$0xff]  ;;  %v970_v50 = vld [vmem:[%s1209_s1 + $0x160] sm:$0xff] }
  0x10   :  { %571 = vmatpush.bf16.msra.mxu2 %v946_v14  ;;  %v988_v44 = vld [vmem:[%s1209_s1 + $0x1f0] sm:$0xff]  ;;  %v987_v48 = vld [vmem:[%s1209_s1 + $0x1e8] sm:$0xff]  ;;  %v978_v51 = vld [vmem:[%s1209_s1 + $0x1a0] sm:$0xff] }
  0x11   :  { %584 = vmatpush.bf16.msra.mxu3 %v954_v15  ;;  %v144_v38 = vld [vmem:[#allocation1 + $0x12] sm:$0xff]  ;;  %v142_v39 = vld [vmem:[#allocation1] sm:$0xff]  ;;  %v143_v42 = vld [vmem:[#allocation1 + $0x9] sm:$0xff] }
  0x12   :  { %546 = vmatpush.bf16.msra.mxu0 %v929_v17  ;;  %v145_v41 = vld [vmem:[#allocation1 + $0x1b] sm:$0xff]  ;;  %v960_v57 = vld [vmem:[%s1209_s1 + $0x110] sm:$0xff]  ;;  %v959_v61 = vld [vmem:[%s1209_s1 + $0x108] sm:$0xff] }
  0x13   :  { %559 = vmatpush.bf16.msra.mxu1 %v937_v18  ;;  %v986_v52 = vld [vmem:[%s1209_s1 + $0x1e0] sm:$0xff]  ;;  %v961_v53 = vld [vmem:[%s1209_s1 + $0x118] sm:$0xff]  ;;  %v968_v58 = vld [vmem:[%s1209_s1 + $0x150] sm:$0xff] }
  0x14   :  { %572 = vmatpush.bf16.msra.mxu2 %v945_v19  ;;  %v969_v54 = vld [vmem:[%s1209_s1 + $0x158] sm:$0xff]  ;;  %v976_v59 = vld [vmem:[%s1209_s1 + $0x190] sm:$0xff]  ;;  %v967_v62 = vld [vmem:[%s1209_s1 + $0x148] sm:$0xff] }
  0x15   :  { %585 = vmatpush.bf16.msra.mxu3 %v953_v20  ;;  %v977_v55 = vld [vmem:[%s1209_s1 + $0x198] sm:$0xff]  ;;  %v984_v60 = vld [vmem:[%s1209_s1 + $0x1d0] sm:$0xff]  ;;  %v975_v63 = vld [vmem:[%s1209_s1 + $0x188] sm:$0xff] }
  0x16   :  { %547 = vmatpush.bf16.msra.mxu0 %v928_v21  ;;  %v985_v56 = vld [vmem:[%s1209_s1 + $0x1d8] sm:$0xff]  ;;  %v983_v0 = vld [vmem:[%s1209_s1 + $0x1c8] sm:$0xff]  ;;  %v958_v1 = vld [vmem:[%s1209_s1 + $0x100] sm:$0xff] }
  0x17   :  { %560 = vmatpush.bf16.msra.mxu1 %v936_v22  ;;  %v966_v2 = vld [vmem:[%s1209_s1 + $0x140] sm:$0xff]  ;;  %v147_v6 = vld [vmem:[#allocation1 + $0x2d] sm:$0xff]  ;;  %v148_v7 = vld [vmem:[#allocation1 + $0x36] sm:$0xff] }
  0x18   :  { %573 = vmatpush.bf16.msra.mxu2 %v944_v23  ;;  %v974_v3 = vld [vmem:[%s1209_s1 + $0x180] sm:$0xff] }
  0x19   :  { %586 = vmatpush.bf16.msra.mxu3 %v952_v24  ;;  %v982_v4 = vld [vmem:[%s1209_s1 + $0x1c0] sm:$0xff] }
  0x1a   :  { %548 = vmatpush.bf16.msra.mxu0 %v927_v25  ;;  %v146_v5 = vld [vmem:[#allocation1 + $0x24] sm:$0xff] }
  0x1b   :  { %561 = vmatpush.bf16.msra.mxu1 %v935_v26  ;;  %v149_v8 = vld [vmem:[#allocation1 + $0x3f] sm:$0xff] }
  0x1c   :  { %574 = vmatpush.bf16.msra.mxu2 %v943_v27 }
  0x1d   :  { %587 = vmatpush.bf16.msra.mxu3 %v951_v28 }
  0x1e   :  { %549 = vmatpush.bf16.msra.mxu0 %v926_v29 }
  0x1f   :  { %562 = vmatpush.bf16.msra.mxu1 %v934_v30 }
  0x20   :  { %575 = vmatpush.bf16.msra.mxu2 %v942_v31 }
  0x21   :  { %588 = vmatpush.bf16.msra.mxu3 %v950_v32  ;;  %550 = vmatmul.bf16.vlgmr.msra.gmra.mxu0 %v142_v39 }
  0x22   :  { %594 = vmatpush.bf16.msrb.mxu0 %v965_v33  ;;  %563 = vmatmul.bf16.vlgmr.msra.gmra.mxu1 %v143_v42 }
  0x23   :  { %607 = vmatpush.bf16.msrb.mxu1 %v973_v34  ;;  %576 = vmatmul.bf16.vlgmr.msra.gmra.mxu2 %v144_v38 }
  0x24   :  { %620 = vmatpush.bf16.msrb.mxu2 %v981_v35  ;;  %589 = vmatmul.bf16.vlgmr.msra.gmra.mxu3 %v145_v41 }
  0x25   :  { %633 = vmatpush.bf16.msrb.mxu3 %v989_v36 }
  0x26   :  { %595 = vmatpush.bf16.msrb.mxu0 %v964_v37 }
  0x27   :  { %608 = vmatpush.bf16.msrb.mxu1 %v972_v40 }
  0x28   :  { %621 = vmatpush.bf16.msrb.mxu2 %v980_v43 }
  0x29   :  { %634 = vmatpush.bf16.msrb.mxu3 %v988_v44 }
  0x2a   :  { %596 = vmatpush.bf16.msrb.mxu0 %v963_v45 }
  0x2b   :  { %609 = vmatpush.bf16.msrb.mxu1 %v971_v46 }
  0x2c   :  { %622 = vmatpush.bf16.msrb.mxu2 %v979_v47 }
  0x2d   :  { %635 = vmatpush.bf16.msrb.mxu3 %v987_v48 }
  0x2e   :  { %597 = vmatpush.bf16.msrb.mxu0 %v962_v49 }
  0x2f   :  { %610 = vmatpush.bf16.msrb.mxu1 %v970_v50 }
  0x30   :  { %623 = vmatpush.bf16.msrb.mxu2 %v978_v51 }
  0x31   :  { %636 = vmatpush.bf16.msrb.mxu3 %v986_v52 }
  0x32   :  { %598 = vmatpush.bf16.msrb.mxu0 %v961_v53 }
  0x33   :  { %611 = vmatpush.bf16.msrb.mxu1 %v969_v54 }
  0x34   :  { %624 = vmatpush.bf16.msrb.mxu2 %v977_v55 }
  0x35   :  { %637 = vmatpush.bf16.msrb.mxu3 %v985_v56 }
  0x36   :  { %599 = vmatpush.bf16.msrb.mxu0 %v960_v57 }
  0x37   :  { %612 = vmatpush.bf16.msrb.mxu1 %v968_v58 }
  0x38   :  { %625 = vmatpush.bf16.msrb.mxu2 %v976_v59 }
  0x39   :  { %638 = vmatpush.bf16.msrb.mxu3 %v984_v60 }
  0x3a   :  { %600 = vmatpush.bf16.msrb.mxu0 %v959_v61 }
  0x3b   :  { %613 = vmatpush.bf16.msrb.mxu1 %v967_v62 }
  0x3c   :  { %626 = vmatpush.bf16.msrb.mxu2 %v975_v63 }
  0x3d   :  { %639 = vmatpush.bf16.msrb.mxu3 %v983_v0 }
  0x3e   :  { %601 = vmatpush.bf16.msrb.mxu0 %v958_v1 }
  0x3f   :  { %614 = vmatpush.bf16.msrb.mxu1 %v966_v2 }
  0x40   :  { %627 = vmatpush.bf16.msrb.mxu2 %v974_v3 }
  0x41   :  { %640 = vmatpush.bf16.msrb.mxu3 %v982_v4  ;;  %602 = vmatmul.bf16.vlgmr.msrb.gmra.mxu0 %v146_v5 }
  0x42   :  { %615 = vmatmul.bf16.vlgmr.msrb.gmra.mxu1 %v147_v6 }
  0x43   :  { %628 = vmatmul.bf16.vlgmr.msrb.gmra.mxu2 %v148_v7 }
  0x44   :  { %641 = vmatmul.bf16.vlgmr.msrb.gmra.mxu3 %v149_v8 }
  0x9e   :  { %v551_v9 = vpop.f32.mrf.mxu0 }
  0x9f   :  { %v564_v10 = vpop.f32.mrf.mxu1 }
  0xa0   :  { %v565_v17 = vadd.f32 %v564_v10, %v551_v9 }
  0xa6   :  { %v577_v11 = vpop.f32.mrf.mxu2  ;;  %v553_v13 = vpop.f32.mrf.mxu0 }
  0xa7   :  { %v590_v12 = vpop.f32.mrf.mxu3  ;;  %v566_v14 = vpop.f32.mrf.mxu1  ;;  %v578_v18 = vadd.f32 %v577_v11, %v565_v17 }
  0xa9   :  { %v591_v19 = vadd.f32 %v590_v12, %v578_v18 }
  0xae   :  { %v579_v15 = vpop.f32.mrf.mxu2 }
  0xaf   :  { %v592_v16 = vpop.f32.mrf.mxu3 }
  0xbe   :  { %v603_v20 = vpop.f32.mrf.mxu0 }
  0xbf   :  { %v616_v21 = vpop.f32.mrf.mxu1  ;;  %v604_v22 = vadd.f32 %v603_v20, %v591_v19 }
  0xc1   :  { %v617_v23 = vadd.f32 %v616_v21, %v604_v22 }
  0xc6   :  { %v629_v24 = vpop.f32.mrf.mxu2  ;;  %v605_v27 = vpop.f32.mrf.mxu0 }
  0xc7   :  { %v642_v25 = vpop.f32.mrf.mxu3  ;;  %v630_v26 = vadd.f32 %v629_v24, %v617_v23  ;;  %v618_v28 = vpop.f32.mrf.mxu1 }
  0xc9   :  { %v643_v29 = vadd.f32 %v642_v25, %v630_v26 }
  0xcb   :  { %v647_v30 = vsel %vm646_vm0, %v643_v29, -inf }
  0xcc   :  { %648 = vmax.xlane.f32.xlu0 %v647_v30 }
  0xce   :  { %v631_v31 = vpop.f32.mrf.mxu2 }
  0xcf   :  { %v644_v32 = vpop.f32.mrf.mxu3 }
 0x13f   :  { %v649_v33 = vpop.xlane.xlu0 %648 }
 0x140   :  { %vm650_vm1 = vweird.f32 %v649_v33 }
 0x141   :  { %vm651_vm3 = vmxor %vm650_vm1, %vm995_vm2 }
 0x142   :  { %v652_v34 = vsel %vm651_vm3, %v649_v33, 0.0 }
 0x143   :  { %v653_v35 = vsub.f32 %v643_v29, %v652_v34 }
 0x145   :  { %v654_v36 = vmul.f32 1.442695, %v653_v35 }
 0x147   :  { %991 = vpow2.f32 %v654_v36 }
 0x14d   :  { %v992_v37 = vpop.eup %991 }
 0x14e   :  { %v656_v38 = vsel %vm646_vm0, %v992_v37, 0.0 }
 0x14f   :  { %657 = vadd.xlane.f32.xlu0 %v656_v38 }
 0x1c2   :  { %v658_v39 = vpop.xlane.xlu0 %657 }
 0x1c3   :  { %993 = vlog2.f32 %v658_v39 }
 0x1c9   :  { %v994_v40 = vpop.eup %993 }
 0x1ca   :  { %v660_v41 = vmul.f32 0.6931472, %v994_v40 }
 0x1cc   :  { %v661_v42 = vadd.f32 %v660_v41, %v652_v34 }
 0x1ce   :  { %v925_v43 = vadd.f32 -2.0794415, %v661_v42 }
 0x1d0   :  { %664 = vst.msk [vmem:[%s1211_s2] sm:$0x3] %vm663_vm4, %v925_v43 }

</bundles_post_ra>
